<compile_context>
chip_gen: v5e
topology: v5e:2x2
jax: 0.10.0
libtpu: 0.0.40
codegen_flags: <defaults>
</compile_context>

<pallas_src>
import functools

import jax
import jax.numpy as jnp
from jax.experimental import pallas as pl
from jax.experimental.pallas import tpu as pltpu


def _round_up(a: int, m: int) -> int:
    return (a + m - 1) // m * m


def _exu_kernel(x_ref, w_ref, b_ref, o_ref, w_exp_ref, brow_ref, *,
                relu_n, tm, mxu_dtype, x_resident):
    # x_ref: (Bp, K) if resident else (tm, K); w_ref: (K, tn); b_ref: (1, K)
    # o_ref: (tm, tn); w_exp_ref: (K, tn) mxu_dtype scratch; brow_ref: (1, tn) f32.
    #
    # Grid = (j: weight-column tile [outer], i: batch tile [inner]).  The exp(weights)
    # cache + bias row refresh only when the inner (batch) sweep restarts; this relies
    # on axis 1 staying sequential ("arbitrary") -- do not mark it parallel.
    @pl.when(pl.program_id(1) == 0)
    def _():
        w_exp_f32 = jnp.exp(w_ref[...].astype(jnp.float32))        # EUP, once per weight tile
        w_exp_ref[...] = w_exp_f32.astype(w_exp_ref.dtype)
        # brow uses the SAME (rounded) expW values as the main matmul so that
        # acc - brow == (x - b) @ expW_cast exactly (no residual bias*(f32-bf16) offset).
        brow_ref[...] = jnp.dot(
            b_ref[...].astype(jnp.float32),
            w_exp_ref[...].astype(jnp.float32),
            preferred_element_type=jnp.float32,
        )

    if x_resident:
        i = pl.program_id(1)
        row0 = pl.multiple_of(i * tm, tm)
        x_blk = x_ref[pl.ds(row0, tm), :]
    else:
        x_blk = x_ref[...]

    acc = jnp.dot(x_blk.astype(mxu_dtype), w_exp_ref[...],          # MXU, f32 accumulate
                  preferred_element_type=jnp.float32)
    out = acc - brow_ref[...]                                       # == (x - b) @ expW
    # relu followed by clamp(0, ReLU_n) == clip to [0, ReLU_n]
    o_ref[...] = jnp.clip(out, 0.0, relu_n).astype(o_ref.dtype)


def exu_layer(x, weights, bias, relu_n=1.0, *, tm=None, tn=None,
              mxu_dtype=jnp.bfloat16, x_resident=None):
    """Pallas ExU forward.

    x:       (B, in_features)
    weights: (in_features, out_features)
    bias:    (in_features,)
    returns: (B, out_features), dtype of x.

    mxu_dtype=jnp.bfloat16 (default) feeds the MXU bf16 with f32 accumulation; the exp
    itself is always computed in f32 on the EUP.  mxu_dtype=jnp.float32 is the exact
    (module-precision) path but ~3x slower on the MXU (multi-pass), especially on v5e.
    """
    B, K = x.shape
    Kw, N = weights.shape
    assert K == Kw and bias.shape == (K,)
    out_dtype = x.dtype
    mxu_dtype = jnp.dtype(mxu_dtype)

    # One-pass wrapper-side downcast of x to the MXU dtype (never upcast): halves x
    # HBM/VMEM bytes on the bf16 path and removes per-step f32->bf16 packs.
    xp = x.astype(mxu_dtype) if mxu_dtype.itemsize < jnp.dtype(x.dtype).itemsize else x
    x_is = jnp.dtype(xp.dtype).itemsize

    # Sublane alignment: packed dtypes want 16-row (bf16) / 32-row (int8) multiples.
    row_align = 16 if x_is == 2 else (32 if x_is == 1 else 8)

    if tm is None:
        tm = min(512, _round_up(B, row_align))
    else:
        tm = _round_up(tm, row_align)
    if tn is None:
        n128 = _round_up(N, 128)
        tn = min(1024, n128)
        # Prefer >= 2 weight-column tiles so the "parallel" axis can split across
        # TensorCores (v7x megacore), as long as tiles stay lane-aligned and >= 512 wide.
        if n128 // tn < 2 and n128 >= 1024:
            tn = _round_up(n128 // 2, 128)
    else:
        tn = _round_up(tn, 128)

    Bp = _round_up(B, tm)
    Np = _round_up(N, tn)
    n_j = Np // tn

    if Bp != B:
        xp = jnp.pad(xp, ((0, Bp - B), (0, 0)))
    wp = weights if Np == N else jnp.pad(weights, ((0, 0), (0, Np - N)))  # exp(0)=1, sliced off
    bias2d = bias.reshape(1, K)   # TPU prefers >=2D operands (sublane x lane)

    # Generation-aware VMEM budget: ~75% of physical capacity.
    # v5e/v6e: 128 MiB -> 96 MiB cap; v7x: 64 MiB -> 48 MiB cap (never request all of it).
    try:
        vmem_cap = int(pltpu.get_tpu_info().vmem_capacity_bytes)
    except Exception:
        vmem_cap = 128 * 2**20
    vmem_budget = (vmem_cap * 3) // 4

    # Keep the whole x resident in VMEM when small: it is then DMA'd from HBM exactly
    # once instead of once per weight-column tile.
    if x_resident is None:
        x_resident = (2 * Bp * K * x_is) <= min(16 * 2**20, vmem_budget // 4)
    x_resident = bool(x_resident)

    w_is = jnp.dtype(weights.dtype).itemsize
    o_is = jnp.dtype(out_dtype).itemsize
    x_block_bytes = (Bp * K * x_is) if x_resident else (tm * K * x_is)
    est = (2 * x_block_bytes                          # x buffers (resident block: no refetch)
           + 2 * K * tn * w_is                        # double-buffered weight tile
           + 2 * tm * tn * o_is                       # double-buffered output tile
           + K * tn * mxu_dtype.itemsize + tn * 4     # scratch: expW cache + bias row
           + 2 * K * 4)                               # bias
    vmem_limit = int(min(vmem_budget, max(32 * 2**20, 2 * est)))

    x_hbm_reads = 1 if x_resident else n_j
    cost = pl.CostEstimate(
        flops=2 * Bp * K * Np + 2 * K * Np,           # main matmul + per-tile bias row
        transcendentals=K * Np,                       # exp(weights), once per weight tile
        bytes_accessed=(x_is * Bp * K * x_hbm_reads + w_is * K * Np
                        + o_is * Bp * Np + 4 * K),
    )

    if x_resident:
        x_spec = pl.BlockSpec((Bp, K), lambda j, i: (0, 0))   # whole x, constant -> one DMA
    else:
        x_spec = pl.BlockSpec((tm, K), lambda j, i: (i, 0))   # per-batch-tile x

    kernel = functools.partial(_exu_kernel, relu_n=float(relu_n), tm=tm,
                               mxu_dtype=mxu_dtype, x_resident=x_resident)

    out = pl.pallas_call(
        kernel,
        out_shape=jax.ShapeDtypeStruct((Bp, Np), out_dtype),
        grid_spec=pltpu.PrefetchScalarGridSpec(
            num_scalar_prefetch=0,
            grid=(n_j, Bp // tm),   # (weight-column tiles [outer], batch tiles [inner])
            in_specs=[
                x_spec,
                pl.BlockSpec((K, tn), lambda j, i: (0, j)),   # constant along i: no re-DMA
                pl.BlockSpec((1, K), lambda j, i: (0, 0)),    # bias (constant)
            ],
            out_specs=pl.BlockSpec((tm, tn), lambda j, i: (i, j)),
            scratch_shapes=[
                pltpu.VMEM((K, tn), mxu_dtype),    # cached exp(weights) tile
                pltpu.VMEM((1, tn), jnp.float32),  # cached bias @ exp(weights) row
            ],
        ),
        compiler_params=pltpu.CompilerParams(
            dimension_semantics=("parallel", "arbitrary"),
            vmem_limit_bytes=vmem_limit,
        ),
        cost_estimate=cost,
    )(xp, wp, bias2d)

    if Bp != B or Np != N:
        out = out[:B, :N]
    return out


def exu_reference(x, weights, bias, relu_n=1.0):
    """Exact (f32) reference matching the PyTorch module."""
    out = (x - bias[None, :]) @ jnp.exp(weights)
    return jnp.clip(jax.nn.relu(out), 0.0, relu_n)


def exu_reference_matched_bf16(x, weights, bias, relu_n=1.0):
    """Reference following the same precision path as the default bf16-MXU kernel."""
    w_exp_c = jnp.exp(weights.astype(jnp.float32)).astype(jnp.bfloat16)
    acc = jnp.dot(x.astype(jnp.bfloat16), w_exp_c, preferred_element_type=jnp.float32)
    b_row = jnp.dot(bias.astype(jnp.float32).reshape(1, -1),
                    w_exp_c.astype(jnp.float32), preferred_element_type=jnp.float32)
    return jnp.clip(acc - b_row, 0.0, relu_n).astype(x.dtype)


if __name__ == "__main__":
    key = jax.random.PRNGKey(0)
    k_x, k_w, k_b, k_x2, k_w2, k_b2 = jax.random.split(key, 6)
    relu_n = 1.0

    # ---- Test A: small module-sized shapes (resident-x path, single weight tile) ----
    B, K, N = 8, 32, 64
    # Deterministic init matching the module: weights ~ N(4.0, 0.5), bias ~ N(0, 0.5)
    weights = 4.0 + 0.5 * jax.random.normal(k_w, (K, N), jnp.float32)
    bias = 0.5 * jax.random.normal(k_b, (K,), jnp.float32)
    x = jax.random.normal(k_x, (B, K), jnp.float32)

    out_f32 = jax.block_until_ready(
        exu_layer(x, weights, bias, relu_n, mxu_dtype=jnp.float32))
    ref = exu_reference(x, weights, bias, relu_n)
    assert out_f32.shape == (B, N)
    assert jnp.allclose(out_f32, ref, atol=2e-3, rtol=2e-3), "f32 path mismatch vs reference"

    out_bf16 = jax.block_until_ready(exu_layer(x, weights, bias, relu_n))
    ref_m = exu_reference_matched_bf16(x, weights, bias, relu_n)
    assert out_bf16.shape == (B, N)
    assert jnp.allclose(out_bf16, ref_m, atol=2e-2, rtol=2e-2), \
        "bf16 path mismatch vs matched-precision reference"

    # ---- Test B: multi-tile grid (2 weight tiles x 3 batch tiles), both x paths ----
    B2, K2, N2 = 40, 32, 256
    w2 = 4.0 + 0.5 * jax.random.normal(k_w2, (K2, N2), jnp.float32)
    b2 = 0.5 * jax.random.normal(k_b2, (K2,), jnp.float32)
    x2 = jax.random.normal(k_x2, (B2, K2), jnp.float32)
    ref2 = exu_reference(x2, w2, b2, relu_n)
    ref2_m = exu_reference_matched_bf16(x2, w2, b2, relu_n)

    out2_res = jax.block_until_ready(exu_layer(x2, w2, b2, relu_n, tm=16, tn=128))
    assert out2_res.shape == (B2, N2)
    assert jnp.allclose(out2_res, ref2_m, atol=2e-2, rtol=2e-2), "resident-x bf16 mismatch"

    out2_tiled = jax.block_until_ready(
        exu_layer(x2, w2, b2, relu_n, tm=16, tn=128, x_resident=False))
    assert jnp.allclose(out2_tiled, ref2_m, atol=2e-2, rtol=2e-2), "tiled-x bf16 mismatch"

    out2_f32 = jax.block_until_ready(
        exu_layer(x2, w2, b2, relu_n, tm=16, tn=128, mxu_dtype=jnp.float32))
    assert jnp.allclose(out2_f32, ref2, atol=2e-3, rtol=2e-3), "f32 multi-tile mismatch"

    print("KERNEL_OK")
</pallas_src>

<mosaic_0001>
module attributes {stable_mosaic.version = 11 : i64} {
  func.func @_exu_kernel(%arg0: i32, %arg1: i32, %arg2: memref<8x32xf32, #tpu.memory_space<vmem>>, %arg3: memref<32x128xf32, #tpu.memory_space<vmem>>, %arg4: memref<1x32xf32, #tpu.memory_space<vmem>>, %arg5: memref<8x128xf32, #tpu.memory_space<vmem>>, %arg6: memref<32x128xf32, #tpu.memory_space<vmem>>, %arg7: memref<1x128xf32, #tpu.memory_space<vmem>>) attributes {dimension_semantics = [#tpu.dimension_semantics<parallel>, #tpu.dimension_semantics<arbitrary>], iteration_bounds = array<i64: 1, 1>, scalar_prefetch = 0 : i64, scratch_operands = 2 : i64, tpu.core_type = #tpu.core_type<tc>, window_params = [{pipeline_mode = #tpu.pipeline_mode<synchronous>, transform_indices = @transform_0, window_bounds = array<i64: 8, 32>}, {transform_indices = @transform_1, window_bounds = array<i64: 32, 128>}, {pipeline_mode = #tpu.pipeline_mode<synchronous>, transform_indices = @transform_2, window_bounds = array<i64: 1, 32>}, {transform_indices = @transform_3, window_bounds = array<i64: 8, 128>}]} {
    %c0_i32 = arith.constant 0 : i32
    %0 = arith.cmpi eq, %arg1, %c0_i32 : i32
    %1 = arith.extui %0 : i1 to i32
    %c0_i32_0 = arith.constant 0 : i32
    %2 = arith.cmpi ne, %1, %c0_i32_0 : i32
    scf.if %2 {
      %c0_9 = arith.constant 0 : index
      %c0_10 = arith.constant 0 : index
      %17 = vector.load %arg3[%c0_9, %c0_10] : memref<32x128xf32, #tpu.memory_space<vmem>>, vector<32x128xf32>
      %18 = math.exp %17 : vector<32x128xf32>
      %c0_11 = arith.constant 0 : index
      %c0_12 = arith.constant 0 : index
      %19 = vector.load %arg6[%c0_11, %c0_12] : memref<32x128xf32, #tpu.memory_space<vmem>>, vector<32x128xf32>
      tpu.vector_store %arg6[%c0_11, %c0_12], %18 {strides = array<i32>} : memref<32x128xf32, #tpu.memory_space<vmem>>, vector<32x128xf32>,
      %c0_13 = arith.constant 0 : index
      %c0_14 = arith.constant 0 : index
      %20 = vector.load %arg4[%c0_13, %c0_14] : memref<1x32xf32, #tpu.memory_space<vmem>>, vector<1x32xf32>
      %c0_15 = arith.constant 0 : index
      %c0_16 = arith.constant 0 : index
      %21 = vector.load %arg6[%c0_15, %c0_16] : memref<32x128xf32, #tpu.memory_space<vmem>>, vector<32x128xf32>
      %cst_17 = arith.constant dense<0.000000e+00> : vector<1x128xf32>
      %22 = tpu.matmul %20, %21, %cst_17 {dimension_numbers = #tpu.dot_dimension_numbers<[1], [0], [0], [1], [0, 0, 1, 1], [], []>} : vector<1x32xf32>, vector<32x128xf32>, vector<1x128xf32> -> vector<1x128xf32>
      %c0_18 = arith.constant 0 : index
      %c0_19 = arith.constant 0 : index
      %23 = vector.load %arg7[%c0_18, %c0_19] : memref<1x128xf32, #tpu.memory_space<vmem>>, vector<1x128xf32>
      tpu.vector_store %arg7[%c0_18, %c0_19], %22 {strides = array<i32>} : memref<1x128xf32, #tpu.memory_space<vmem>>, vector<1x128xf32>,
    } else {
    }
    %c8_i32 = arith.constant 8 : i32
    %3 = arith.muli %arg1, %c8_i32 : i32
    %4 = tpu.assume_multiple %3, 8 : i32
    %5 = arith.index_cast %4 : i32 to index
    %c0 = arith.constant 0 : index
    %6 = vector.load %arg2[%5, %c0] : memref<8x32xf32, #tpu.memory_space<vmem>>, vector<8x32xf32>
    %c0_1 = arith.constant 0 : index
    %c0_2 = arith.constant 0 : index
    %7 = vector.load %arg6[%c0_1, %c0_2] : memref<32x128xf32, #tpu.memory_space<vmem>>, vector<32x128xf32>
    %cst = arith.constant dense<0.000000e+00> : vector<8x128xf32>
    %8 = tpu.matmul %6, %7, %cst {dimension_numbers = #tpu.dot_dimension_numbers<[1], [0], [0], [1], [0, 0, 1, 1], [], []>} : vector<8x32xf32>, vector<32x128xf32>, vector<8x128xf32> -> vector<8x128xf32>
    %c0_3 = arith.constant 0 : index
    %c0_4 = arith.constant 0 : index
    %9 = vector.load %arg7[%c0_3, %c0_4] : memref<1x128xf32, #tpu.memory_space<vmem>>, vector<1x128xf32>
    %10 = vector.broadcast %9 : vector<1x128xf32> to vector<8x128xf32>
    %11 = arith.subf %8, %10 : vector<8x128xf32>
    %cst_5 = arith.constant 0.000000e+00 : f32
    %cst_6 = arith.constant 1.000000e+00 : f32
    %12 = vector.broadcast %cst_5 : f32 to vector<8x128xf32>
    %13 = arith.maximumf %12, %11 : vector<8x128xf32>
    %14 = vector.broadcast %cst_6 : f32 to vector<8x128xf32>
    %15 = arith.minimumf %14, %13 : vector<8x128xf32>
    %c0_7 = arith.constant 0 : index
    %c0_8 = arith.constant 0 : index
    %16 = vector.load %arg5[%c0_7, %c0_8] : memref<8x128xf32, #tpu.memory_space<vmem>>, vector<8x128xf32>
    tpu.vector_store %arg5[%c0_7, %c0_8], %15 {strides = array<i32>} : memref<8x128xf32, #tpu.memory_space<vmem>>, vector<8x128xf32>,
    return
  }
  func.func @transform_0(%arg0: i32, %arg1: i32) -> (i32, i32) {
    %c0_i32 = arith.constant 0 : i32
    %c0_i32_0 = arith.constant 0 : i32
    %c0_i32_1 = arith.constant 0 : i32
    return %c0_i32, %c0_i32_0 : i32, i32
  }
  func.func @transform_1(%arg0: i32, %arg1: i32) -> (i32, i32) {
    %c0_i32 = arith.constant 0 : i32
    %c0_i32_0 = arith.constant 0 : i32
    return %c0_i32, %arg0 : i32, i32
  }
  func.func @transform_2(%arg0: i32, %arg1: i32) -> (i32, i32) {
    %c0_i32 = arith.constant 0 : i32
    %c0_i32_0 = arith.constant 0 : i32
    %c0_i32_1 = arith.constant 0 : i32
    return %c0_i32, %c0_i32_0 : i32, i32
  }
  func.func @transform_3(%arg0: i32, %arg1: i32) -> (i32, i32) {
    %c0_i32 = arith.constant 0 : i32
    return %arg1, %arg0 : i32, i32
  }
}

</mosaic_0001>

<bundles_post_ra>
// kernel: tpu_custom_call.1
= control target key start
LH: loop header
LB: loop body
LE: loop exit
PB: predicated region body
PF: predicated region fallthrough
CT: control target
= control target key end

     0   :  { %8 = vsyncpa [#allocation5], 0  ;;  %s283_s0 = inlined_call_operand.hbm [shape: f32[8,32], index: 0, kind: input, shape index: {}]   ;;  %s284_s1 = inlined_call_operand.hbm [shape: f32[32,128], index: 1, kind: input, shape index: {}]   ;;  %s285_s2 = inlined_call_operand.vmem [shape: f32[1,32], index: 2, kind: input, shape index: {}]   ;;  %s286_s3 = inlined_call_operand.hbm [shape: f32[8,128], index: 3, kind: output, shape index: {}]  }
   0x1   :  { %9 = vsyncpa [#allocation8], 0 }
   0x2   :  { %10 = vsyncpa [#allocation6], 0  ;;  %s16_s14 = sshll.u32 %s283_s0, 4  ;;  %s246_s15 = smov [#allocation4]   ;;  %s17_s14 = int_to_ptr.hbm [resolvable:$true] %s16_s14 }
   0x3   :  { %s18_s16 = sshll.u32 %s246_s15, 4  ;;  %s26_s19 = sshll.u32 %s284_s1, 4  ;;  %s19_s16 = int_to_ptr.vmem [resolvable:$true] %s18_s16  ;;  %s27_s19 = int_to_ptr.hbm [resolvable:$true] %s26_s19 }
   0x4   :  { %21 = dma.hbm_to_vmem [thread:$0]  %s17_s14, 128, %s19_s16, [#allocation5]  }
   0x5   :  { %s247_s20 = smov [#allocation7]   ;;  %s248_s22 = smov 128  }
   0x6   :  { %s28_s21 = sshll.u32 %s247_s20, 4  ;;  %s249_s23 = smov 8   ;;  %s29_s21 = int_to_ptr.vmem [resolvable:$true] %s28_s21 }
   0x7   :  { %34 = dma.hbm_to_vmem [thread:$0]  %s27_s19, 512, %s29_s21, [#allocation8], %s248_s22, %s248_s22, %s249_s23  }
   0x8   :  { %240 = dma.done.wait [#allocation5], 128  }
   0x9   :  { %241 = vsyncadd [#allocation5], 4294967168 }
   0xa   :  { %242 = dma.done.wait [#allocation8], 512  }
   0xb   :  { %243 = vsyncadd [#allocation8], 4294966784  ;;  %v52_v0 = vld [vmem:[#allocation7 + $0x18] sm:$0xff]  ;;  %v51_v1 = vld [vmem:[#allocation7 + $0x10] sm:$0xff]  ;;  %vm70_vm0 = vcmask 261120   ;;  %s250_s24 = smov [#allocation9]  }
   0xc   :  { %v50_v2 = vld [vmem:[#allocation7 + $0x8] sm:$0xff]  ;;  %v59_v3 = vmul.f32 1.442695, %v52_v0  ;;  %v57_v4 = vmul.f32 1.442695, %v51_v1  ;;  %v49_v6 = vld [vmem:[#allocation7] sm:$0xff] }
   0xd   :  { %v55_v5 = vmul.f32 1.442695, %v50_v2  ;;  %v53_v7 = vmul.f32 1.442695, %v49_v6  ;;  %v65_v12 = vld [vmem:[%s285_s2] sm:$0x1] }
   0xe   :  { %160 = vpow2.f32 %v59_v3  ;;  %v97_v13 = vld [vmem:[#allocation4] sm:$0xff]  ;;  %s139_s25 = sshll.u32 %s250_s24, 4  ;;  %s141_s28 = sshll.u32 %s286_s3, 4  ;;  %s140_s25 = int_to_ptr.vmem [resolvable:$true] %s139_s25  ;;  %s142_s28 = int_to_ptr.hbm [resolvable:$true] %s141_s28 }
   0xf   :  { %162 = vpow2.f32 %v57_v4 }
  0x10   :  { %164 = vpow2.f32 %v55_v5 }
  0x11   :  { %166 = vpow2.f32 %v53_v7 }
  0x14   :  { %v161_v8 = vpop.eup %160 }
  0x15   :  { %v163_v9 = vpop.eup %162  ;;  %86 = vmatpush.msra.mxu0 %v161_v8  ;;  %118 = vmatpush.msra.mxu1 %v161_v8 }
  0x16   :  { %v165_v10 = vpop.eup %164 }
  0x17   :  { %87 = vmatpush.msra.mxu0 %v163_v9  ;;  %119 = vmatpush.msra.mxu1 %v163_v9  ;;  %v167_v11 = vpop.eup %166 }
  0x19   :  { %88 = vmatpush.msra.mxu0 %v165_v10  ;;  %120 = vmatpush.msra.mxu1 %v165_v10 }
  0x1b   :  { %89 = vmatpush.msra.mxu0 %v167_v11  ;;  %121 = vmatpush.msra.mxu1 %v167_v11 }
  0x1c   :  { %152 = vmatmul.msk.f32.vlgmr.msra.gmra.mxu0 %vm70_vm0, %v65_v12  ;;  %153 = vmatmul.msk.f32.vlgmr.msra.gmra.mxu1 %vm70_vm0, %v97_v13 }
  0x99   :  { %v91_v14 = vpop.f32.mrf.mxu0  ;;  %v123_v15 = vpop.f32.mrf.mxu1 }
  0x9a   :  { %94 = vst [vmem:[#allocation3] sm:$0x1] %v91_v14 }
  0xa1   :  { %v159_v16 = vld [vmem:[#allocation3] ss:$0 sm:$0xff] }
  0xa2   :  { %v130_v17 = vsub.f32 %v123_v15, %v159_v16 }
  0xa4   :  { %v131_v18 = vmax.f32 %v130_v17, 0.0 }
  0xa6   :  { %v132_v19 = vmin.f32 %v131_v18, 1.0 }
  0xa8   :  { %133 = vst [vmem:[#allocation9] sm:$0xff] %v132_v19 }
  0xa9   :  { %144 = dma.vmem_to_hbm [thread:$0]  %s140_s25, 128, %s142_s28, [#allocation6]  }
  0xaa   :  { %244 = dma.done.wait [#allocation6], 128  }
  0xab   :  { %245 = vsyncadd [#allocation6], 4294967168 }
  0xac   :  { %149 = vsyncpa [#allocation5], 1 }
  0xad   :  { %150 = vsyncpa [#allocation8], 1 }
  0xae   :  { %151 = vsyncpa [#allocation6], 1 }

</bundles_post_ra>
